<compile_context>
chip_gen: v7x
topology: tpu7x:2x2x1
jax: 0.10.0
libtpu: 0.0.40
codegen_flags: <defaults>
</compile_context>

<pallas_src>
import jax
import jax.numpy as jnp
from jax.experimental import pallas as pl
from jax.experimental.pallas import tpu as pltpu

# ---------------- model hyper-params (small demo sizes) -----------------------
SPAN_REPR_DIM = 32
DISTANCE_DIM = 20
GENRE_DIM = 20
SPEAKER_DIM = 20
HIDDEN_DIM = 128                     # lane-aligned (repo uses 150 -> pad to 128/256)
PHI_DIM = DISTANCE_DIM + GENRE_DIM + SPEAKER_DIM
PAIR_DIM = SPAN_REPR_DIM * 3 + PHI_DIM

# TODO(synk): verify bucket boundary semantics vs the original DistanceEmbedder
#             (torch.bucketize left/right at exact edges 1,2,3,4,8,...).
DIST_BINS = jnp.array([1, 2, 3, 4, 8, 16, 32, 64], dtype=jnp.int32)
N_DIST = 9
N_GENRE = 8                          # padding_idx=0
N_SPEAKER = 3                        # padding_idx=0


# ------------------------------ fused Pallas kernel ----------------------------
def _pairwise_scorer_kernel(m_r_ref, a_r_ref, phi_h_ref, base_ref,
                            w1m_ref, w1a_ref, w1p_ref, b1_ref,
                            w2_ref, b2_ref, w3_ref,
                            scores_ref, probs_ref):
    bs, d = m_r_ref.shape                      # spans in this block, repr dim
    pk = a_r_ref.shape[0]                      # pairs in this block = bs * K
    k = pk // bs
    h = w1m_ref.shape[1]

    # Mention reprs: load the span rows once, broadcast to pair level in-register.
    m_r = m_r_ref[...].astype(jnp.float32)                              # (bs, d)
    a_rb = a_r_ref[...]                                                 # bf16 (pk, d)
    a_rf = a_rb.astype(jnp.float32)
    m_rep = jnp.broadcast_to(m_r[:, None, :], (bs, k, d)).reshape(pk, d)  # f32
    prod = m_rep * a_rf                        # elementwise in f32 (v5e-safe)

    # First layer as split-weight dots (no concat / lane relayout); f32 accum.
    h1 = jnp.dot(m_rep.astype(jnp.bfloat16), w1m_ref[...],
                 preferred_element_type=jnp.float32)
    h1 = h1 + jnp.dot(a_rb, w1a_ref[...], preferred_element_type=jnp.float32)
    h1 = h1 + jnp.dot(prod.astype(jnp.bfloat16), w1p_ref[...],
                      preferred_element_type=jnp.float32)
    h1 = h1 + phi_h_ref[...].astype(jnp.float32) + b1_ref[...]
    h1 = jnp.maximum(h1, 0.0)

    h2 = jnp.dot(h1.astype(jnp.bfloat16), w2_ref[...],
                 preferred_element_type=jnp.float32) + b2_ref[...]
    h2 = jnp.maximum(h2, 0.0)

    # Final (H -> 1) layer as a lane reduction; group pairs back per span.
    am = jnp.sum(h2.reshape(bs, k, h) * w3_ref[...].reshape(1, 1, h),
                 axis=-1)                                               # (bs, k)
    scores = base_ref[...] + am                # base = m_s + a_s + b3
    scores_ref[...] = scores

    # Fused per-span softmax over (K antecedent scores ++ epsilon logit 0).
    mx = jnp.maximum(jnp.max(scores, axis=1, keepdims=True), 0.0)       # incl. eps
    ex = jnp.exp(scores - mx)                                           # (bs, k)
    eps_ex = jnp.exp(-mx)                                               # (bs, 1)
    inv = pl.reciprocal(jnp.sum(ex, axis=1, keepdims=True) + eps_ex, approx=True)
    probs_ref[:, :k] = ex * inv
    probs_ref[:, k:] = eps_ex * inv


# ------------------------------ forward wrapper --------------------------------
def pairwise_scorer_forward(span_reprs, mention_scores, antecedent_ids,
                            distances, genre_ids, speaker_ids, params,
                            block_spans=16):
    S, D = span_reprs.shape
    P = antecedent_ids.shape[0]
    K = P // S
    H = params['w2'].shape[0]

    bs = min(block_spans, S)
    assert S % bs == 0 and bs % 8 == 0 and (bs * K) % 16 == 0

    # ---- XLA glue: pre-project phi embedding tables through their W1 rows -----
    w1 = params['w1']
    d0 = 3 * SPAN_REPR_DIM
    dist_h = params['dist_emb'] @ w1[d0:d0 + DISTANCE_DIM]
    genre_h = params['genre_emb'] @ w1[d0 + DISTANCE_DIM:d0 + DISTANCE_DIM + GENRE_DIM]
    spk_h = params['speaker_emb'] @ w1[d0 + DISTANCE_DIM + GENRE_DIM:]

    dist_bucket = jnp.sum(distances[:, None] >= DIST_BINS[None, :],
                          axis=1).astype(jnp.int32)
    phi_h = (jnp.take(dist_h, dist_bucket, axis=0)
             + jnp.take(genre_h, genre_ids, axis=0)
             + jnp.take(spk_h, speaker_ids, axis=0)).astype(jnp.bfloat16)  # (P, H)

    # Mention rows are the span rows themselves (pairs grouped per span), so no
    # duplicated m_r gather.  Antecedent reprs still gathered by XLA.
    # TODO(synk): move the antecedent-row gather in-kernel (scalar-prefetch DMA).
    m_r = span_reprs.astype(jnp.bfloat16)                                   # (S, D)
    a_r = jnp.take(span_reprs, antecedent_ids, axis=0).astype(jnp.bfloat16)  # (P, D)

    a_s = jnp.take(mention_scores, antecedent_ids, axis=0).reshape(S, K)
    base = mention_scores.reshape(S, 1) + a_s + params['b3'].reshape(1, 1)  # (S, K)

    w1m = w1[0:D].astype(jnp.bfloat16)
    w1a = w1[D:2 * D].astype(jnp.bfloat16)
    w1p = w1[2 * D:3 * D].astype(jnp.bfloat16)
    w2 = params['w2'].astype(jnp.bfloat16)
    b1 = params['b1'].reshape(1, H)
    b2 = params['b2'].reshape(1, H)
    w3 = params['w3'].reshape(1, H)

    pair_rows = bs * K
    flops = 2 * P * (3 * D * H + H * H + H)
    bytes_accessed = (S * D * 2 + P * D * 2 + P * H * 2 + S * K * 4
                      + (3 * D * H + H * H) * 2 + 3 * H * 4
                      + S * K * 4 + S * (K + 1) * 4)

    scores, probs = pl.pallas_call(
        _pairwise_scorer_kernel,
        out_shape=(jax.ShapeDtypeStruct((S, K), jnp.float32),
                   jax.ShapeDtypeStruct((S, K + 1), jnp.float32)),
        grid=(S // bs,),
        in_specs=[
            pl.BlockSpec((bs, D), lambda i: (i, 0)),          # m_r (span reprs)
            pl.BlockSpec((pair_rows, D), lambda i: (i, 0)),   # a_r
            pl.BlockSpec((pair_rows, H), lambda i: (i, 0)),   # phi_h (pre-projected)
            pl.BlockSpec((bs, K), lambda i: (i, 0)),          # base = m_s + a_s + b3
            pl.BlockSpec((D, H), lambda i: (0, 0)),           # w1 rows for m_r
            pl.BlockSpec((D, H), lambda i: (0, 0)),           # w1 rows for a_r
            pl.BlockSpec((D, H), lambda i: (0, 0)),           # w1 rows for m_r*a_r
            pl.BlockSpec((1, H), lambda i: (0, 0)),           # b1
            pl.BlockSpec((H, H), lambda i: (0, 0)),           # w2
            pl.BlockSpec((1, H), lambda i: (0, 0)),           # b2
            pl.BlockSpec((1, H), lambda i: (0, 0)),           # w3 (row)
        ],
        out_specs=(
            pl.BlockSpec((bs, K), lambda i: (i, 0)),
            pl.BlockSpec((bs, K + 1), lambda i: (i, 0)),
        ),
        compiler_params=pltpu.CompilerParams(
            dimension_semantics=("parallel",)),
        cost_estimate=pl.CostEstimate(flops=flops, transcendentals=P + 2 * S,
                                      bytes_accessed=bytes_accessed),
    )(m_r, a_r, phi_h, base, w1m, w1a, w1p, b1, w2, b2, w3)

    coref_scores = scores.reshape(P, 1)

    # `[empty] + split` + pad_and_stack(value=1000).squeeze(): the prepended empty
    # group softmaxes to [1.0] and is padded with 1000s.
    # TODO(synk): verify pad_and_stack squeeze orientation against the original.
    first = jnp.concatenate([jnp.ones((1, 1), jnp.float32),
                             jnp.full((1, K), 1000.0, jnp.float32)], axis=1)
    padded_probs = jnp.concatenate([first, probs], axis=0)                 # (S+1, K+1)
    return coref_scores, padded_probs


# ------------------------------ pure-JAX reference -----------------------------
def reference_forward(span_reprs, mention_scores, antecedent_ids,
                      distances, genre_ids, speaker_ids, params):
    S = span_reprs.shape[0]
    P = antecedent_ids.shape[0]
    K = P // S
    mention_ids = jnp.repeat(jnp.arange(S, dtype=jnp.int32), K)
    dist_bucket = jnp.sum(distances[:, None] >= DIST_BINS[None, :],
                          axis=1).astype(jnp.int32)
    phi = jnp.concatenate([params['dist_emb'][dist_bucket],
                           params['genre_emb'][genre_ids],
                           params['speaker_emb'][speaker_ids]], axis=1)
    m_r = span_reprs[mention_ids]
    a_r = span_reprs[antecedent_ids]
    pairs = jnp.concatenate([m_r, a_r, m_r * a_r, phi], axis=1)
    h1 = jax.nn.relu(pairs @ params['w1'] + params['b1'])
    h2 = jax.nn.relu(h1 @ params['w2'] + params['b2'])
    am = h2 @ params['w3'] + params['b3']
    coref = mention_scores[mention_ids] + mention_scores[antecedent_ids] + am
    grp = jnp.concatenate([coref.reshape(S, K), jnp.zeros((S, 1), jnp.float32)],
                          axis=1)
    probs = jax.nn.softmax(grp, axis=1)
    first = jnp.concatenate([jnp.ones((1, 1), jnp.float32),
                             jnp.full((1, K), 1000.0, jnp.float32)], axis=1)
    return coref, jnp.concatenate([first, probs], axis=0)


# ------------------------------ parameter init ---------------------------------
def init_params(key):
    ks = jax.random.split(key, 6)
    dist_emb = 0.02 * jax.random.normal(ks[0], (N_DIST, DISTANCE_DIM), jnp.float32)
    genre_emb = 0.02 * jax.random.normal(ks[1], (N_GENRE, GENRE_DIM), jnp.float32)
    genre_emb = genre_emb.at[0].set(0.0)           # padding_idx=0
    speaker_emb = 0.02 * jax.random.normal(ks[2], (N_SPEAKER, SPEAKER_DIM), jnp.float32)
    speaker_emb = speaker_emb.at[0].set(0.0)       # padding_idx=0
    return {
        'dist_emb': dist_emb, 'genre_emb': genre_emb, 'speaker_emb': speaker_emb,
        'w1': 0.05 * jax.random.normal(ks[3], (PAIR_DIM, HIDDEN_DIM), jnp.float32),
        'b1': jnp.zeros((1, HIDDEN_DIM), jnp.float32),
        'w2': 0.05 * jax.random.normal(ks[4], (HIDDEN_DIM, HIDDEN_DIM), jnp.float32),
        'b2': jnp.zeros((1, HIDDEN_DIM), jnp.float32),
        'w3': 0.05 * jax.random.normal(ks[5], (HIDDEN_DIM, 1), jnp.float32),
        'b3': jnp.zeros((1, 1), jnp.float32),
    }


# ------------------------------------ main --------------------------------------
if __name__ == "__main__":
    S = 64          # number of spans
    K = 4           # antecedents per span (fixed -> static shapes)
    P = S * K       # number of (mention, antecedent) pairs

    key = jax.random.PRNGKey(0)
    k_param, k_repr, k_score, k_ant, k_dist, k_gen, k_spk = jax.random.split(key, 7)

    params = init_params(k_param)
    span_reprs = jax.random.normal(k_repr, (S, SPAN_REPR_DIM), jnp.float32)
    mention_scores = jax.random.normal(k_score, (S, 1), jnp.float32)
    antecedent_ids = jax.random.randint(k_ant, (P,), 0, S, dtype=jnp.int32)
    distances = jax.random.randint(k_dist, (P,), 1, 100, dtype=jnp.int32)
    genre_ids = jax.random.randint(k_gen, (P,), 0, N_GENRE, dtype=jnp.int32)
    speaker_ids = jax.random.randint(k_spk, (P,), 0, N_SPEAKER, dtype=jnp.int32)

    fwd = jax.jit(pairwise_scorer_forward)
    coref_scores, padded_probs = fwd(span_reprs, mention_scores, antecedent_ids,
                                     distances, genre_ids, speaker_ids, params)
    jax.block_until_ready((coref_scores, padded_probs))

    ref_scores, ref_probs = reference_forward(span_reprs, mention_scores,
                                              antecedent_ids, distances,
                                              genre_ids, speaker_ids, params)

    assert coref_scores.shape == (P, 1)
    assert padded_probs.shape == (S + 1, K + 1)
    # kernel (bf16 matmuls + approx reciprocal) vs f32 reference
    assert bool(jnp.allclose(coref_scores, ref_scores, atol=2e-2))
    assert bool(jnp.allclose(padded_probs, ref_probs, atol=2e-2))
    # each real span group's probs sum to 1
    assert bool(jnp.allclose(jnp.sum(padded_probs[1:], axis=1), 1.0, atol=2e-2))
    print("KERNEL_OK")
</pallas_src>

<mosaic_0001>
module attributes {stable_mosaic.version = 11 : i64} {
  func.func @_pairwise_scorer_kernel(%arg0: i32, %arg1: memref<16x32xbf16, #tpu.memory_space<vmem>>, %arg2: memref<64x32xbf16, #tpu.memory_space<vmem>>, %arg3: memref<64x128xbf16, #tpu.memory_space<vmem>>, %arg4: memref<16x4xf32, #tpu.memory_space<vmem>>, %arg5: memref<32x128xbf16, #tpu.memory_space<vmem>>, %arg6: memref<32x128xbf16, #tpu.memory_space<vmem>>, %arg7: memref<32x128xbf16, #tpu.memory_space<vmem>>, %arg8: memref<1x128xf32, #tpu.memory_space<vmem>>, %arg9: memref<128x128xbf16, #tpu.memory_space<vmem>>, %arg10: memref<1x128xf32, #tpu.memory_space<vmem>>, %arg11: memref<1x128xf32, #tpu.memory_space<vmem>>, %arg12: memref<16x4xf32, #tpu.memory_space<vmem>>, %arg13: memref<16x5xf32, #tpu.memory_space<vmem>>) attributes {dimension_semantics = [#tpu.dimension_semantics<parallel>], iteration_bounds = array<i64: 4>, scalar_prefetch = 0 : i64, scratch_operands = 0 : i64, tpu.core_type = #tpu.core_type<tc>, window_params = [{transform_indices = @transform_0, window_bounds = array<i64: 16, 32>}, {transform_indices = @transform_1, window_bounds = array<i64: 64, 32>}, {transform_indices = @transform_2, window_bounds = array<i64: 64, 128>}, {transform_indices = @transform_3, window_bounds = array<i64: 16, 4>}, {pipeline_mode = #tpu.pipeline_mode<synchronous>, transform_indices = @transform_4, window_bounds = array<i64: 32, 128>}, {pipeline_mode = #tpu.pipeline_mode<synchronous>, transform_indices = @transform_5, window_bounds = array<i64: 32, 128>}, {pipeline_mode = #tpu.pipeline_mode<synchronous>, transform_indices = @transform_6, window_bounds = array<i64: 32, 128>}, {pipeline_mode = #tpu.pipeline_mode<synchronous>, transform_indices = @transform_7, window_bounds = array<i64: 1, 128>}, {pipeline_mode = #tpu.pipeline_mode<synchronous>, transform_indices = @transform_8, window_bounds = array<i64: 128, 128>}, {pipeline_mode = #tpu.pipeline_mode<synchronous>, transform_indices = @transform_9, window_bounds = array<i64: 1, 128>}, {pipeline_mode = #tpu.pipeline_mode<synchronous>, transform_indices = @transform_10, window_bounds = array<i64: 1, 128>}, {transform_indices = @transform_11, window_bounds = array<i64: 16, 4>}, {transform_indices = @transform_12, window_bounds = array<i64: 16, 5>}]} {
    %c0 = arith.constant 0 : index
    %c0_0 = arith.constant 0 : index
    %0 = vector.load %arg1[%c0, %c0_0] : memref<16x32xbf16, #tpu.memory_space<vmem>>, vector<16x32xbf16>
    %1 = arith.extf %0 : vector<16x32xbf16> to vector<16x32xf32>
    %c0_1 = arith.constant 0 : index
    %c0_2 = arith.constant 0 : index
    %2 = vector.load %arg2[%c0_1, %c0_2] : memref<64x32xbf16, #tpu.memory_space<vmem>>, vector<64x32xbf16>
    %3 = arith.extf %2 : vector<64x32xbf16> to vector<64x32xf32>
    %4 = vector.shape_cast %1 : vector<16x32xf32> to vector<16x1x32xf32>
    %5 = vector.shape_cast %4 : vector<16x1x32xf32> to vector<16x1x32xf32>
    %6 = vector.broadcast %5 : vector<16x1x32xf32> to vector<16x4x32xf32>
    %7 = vector.shape_cast %6 : vector<16x4x32xf32> to vector<64x32xf32>
    %8 = arith.mulf %7, %3 : vector<64x32xf32>
    %9 = arith.truncf %7 : vector<64x32xf32> to vector<64x32xbf16>
    %c0_3 = arith.constant 0 : index
    %c0_4 = arith.constant 0 : index
    %10 = vector.load %arg5[%c0_3, %c0_4] : memref<32x128xbf16, #tpu.memory_space<vmem>>, vector<32x128xbf16>
    %cst = arith.constant dense<0.000000e+00> : vector<64x128xf32>
    %11 = tpu.matmul %9, %10, %cst {dimension_numbers = #tpu.dot_dimension_numbers<[1], [0], [0], [1], [0, 0, 1, 1], [], []>} : vector<64x32xbf16>, vector<32x128xbf16>, vector<64x128xf32> -> vector<64x128xf32>
    %c0_5 = arith.constant 0 : index
    %c0_6 = arith.constant 0 : index
    %12 = vector.load %arg6[%c0_5, %c0_6] : memref<32x128xbf16, #tpu.memory_space<vmem>>, vector<32x128xbf16>
    %cst_7 = arith.constant dense<0.000000e+00> : vector<64x128xf32>
    %13 = tpu.matmul %2, %12, %cst_7 {dimension_numbers = #tpu.dot_dimension_numbers<[1], [0], [0], [1], [0, 0, 1, 1], [], []>} : vector<64x32xbf16>, vector<32x128xbf16>, vector<64x128xf32> -> vector<64x128xf32>
    %14 = arith.addf %11, %13 : vector<64x128xf32>
    %15 = arith.truncf %8 : vector<64x32xf32> to vector<64x32xbf16>
    %c0_8 = arith.constant 0 : index
    %c0_9 = arith.constant 0 : index
    %16 = vector.load %arg7[%c0_8, %c0_9] : memref<32x128xbf16, #tpu.memory_space<vmem>>, vector<32x128xbf16>
    %cst_10 = arith.constant dense<0.000000e+00> : vector<64x128xf32>
    %17 = tpu.matmul %15, %16, %cst_10 {dimension_numbers = #tpu.dot_dimension_numbers<[1], [0], [0], [1], [0, 0, 1, 1], [], []>} : vector<64x32xbf16>, vector<32x128xbf16>, vector<64x128xf32> -> vector<64x128xf32>
    %18 = arith.addf %14, %17 : vector<64x128xf32>
    %c0_11 = arith.constant 0 : index
    %c0_12 = arith.constant 0 : index
    %19 = vector.load %arg3[%c0_11, %c0_12] : memref<64x128xbf16, #tpu.memory_space<vmem>>, vector<64x128xbf16>
    %20 = arith.extf %19 : vector<64x128xbf16> to vector<64x128xf32>
    %21 = arith.addf %18, %20 : vector<64x128xf32>
    %c0_13 = arith.constant 0 : index
    %c0_14 = arith.constant 0 : index
    %22 = vector.load %arg8[%c0_13, %c0_14] : memref<1x128xf32, #tpu.memory_space<vmem>>, vector<1x128xf32>
    %23 = vector.broadcast %22 : vector<1x128xf32> to vector<64x128xf32>
    %24 = arith.addf %21, %23 : vector<64x128xf32>
    %cst_15 = arith.constant 0.000000e+00 : f32
    %25 = vector.broadcast %cst_15 : f32 to vector<64x128xf32>
    %26 = arith.maximumf %24, %25 : vector<64x128xf32>
    %27 = arith.truncf %26 : vector<64x128xf32> to vector<64x128xbf16>
    %c0_16 = arith.constant 0 : index
    %c0_17 = arith.constant 0 : index
    %28 = vector.load %arg9[%c0_16, %c0_17] : memref<128x128xbf16, #tpu.memory_space<vmem>>, vector<128x128xbf16>
    %cst_18 = arith.constant dense<0.000000e+00> : vector<64x128xf32>
    %29 = tpu.matmul %27, %28, %cst_18 {dimension_numbers = #tpu.dot_dimension_numbers<[1], [0], [0], [1], [0, 0, 1, 1], [], []>} : vector<64x128xbf16>, vector<128x128xbf16>, vector<64x128xf32> -> vector<64x128xf32>
    %c0_19 = arith.constant 0 : index
    %c0_20 = arith.constant 0 : index
    %30 = vector.load %arg10[%c0_19, %c0_20] : memref<1x128xf32, #tpu.memory_space<vmem>>, vector<1x128xf32>
    %31 = vector.broadcast %30 : vector<1x128xf32> to vector<64x128xf32>
    %32 = arith.addf %29, %31 : vector<64x128xf32>
    %cst_21 = arith.constant 0.000000e+00 : f32
    %33 = vector.broadcast %cst_21 : f32 to vector<64x128xf32>
    %34 = arith.maximumf %32, %33 : vector<64x128xf32>
    %35 = vector.shape_cast %34 : vector<64x128xf32> to vector<16x4x128xf32>
    %c0_22 = arith.constant 0 : index
    %c0_23 = arith.constant 0 : index
    %36 = vector.load %arg11[%c0_22, %c0_23] : memref<1x128xf32, #tpu.memory_space<vmem>>, vector<1x128xf32>
    %37 = vector.shape_cast %36 : vector<1x128xf32> to vector<1x1x128xf32>
    %38 = vector.broadcast %37 : vector<1x1x128xf32> to vector<16x4x128xf32>
    %39 = arith.mulf %35, %38 : vector<16x4x128xf32>
    %cst_24 = arith.constant dense<0.000000e+00> : vector<16x4xf32>
    %40 = vector.multi_reduction <add>, %39, %cst_24 [2] : vector<16x4x128xf32> to vector<16x4xf32>
    %c0_25 = arith.constant 0 : index
    %c0_26 = arith.constant 0 : index
    %41 = vector.load %arg4[%c0_25, %c0_26] : memref<16x4xf32, #tpu.memory_space<vmem>>, vector<16x4xf32>
    %42 = arith.addf %41, %40 : vector<16x4xf32>
    %c0_27 = arith.constant 0 : index
    %c0_28 = arith.constant 0 : index
    %43 = vector.load %arg12[%c0_27, %c0_28] : memref<16x4xf32, #tpu.memory_space<vmem>>, vector<16x4xf32>
    tpu.vector_store %arg12[%c0_27, %c0_28], %42 {strides = array<i32>} : memref<16x4xf32, #tpu.memory_space<vmem>>, vector<16x4xf32>,
    %cst_29 = arith.constant dense<0xFF800000> : vector<16xf32>
    %44 = vector.multi_reduction <maximumf>, %42, %cst_29 [1] : vector<16x4xf32> to vector<16xf32>
    %45 = vector.shape_cast %44 : vector<16xf32> to vector<16x1xf32>
    %cst_30 = arith.constant 0.000000e+00 : f32
    %46 = vector.broadcast %cst_30 : f32 to vector<16x1xf32>
    %47 = arith.maximumf %45, %46 : vector<16x1xf32>
    %48 = vector.broadcast %47 : vector<16x1xf32> to vector<16x4xf32>
    %49 = arith.subf %42, %48 : vector<16x4xf32>
    %50 = math.exp %49 : vector<16x4xf32>
    %cst_31 = arith.constant 0.000000e+00 : f32
    %51 = vector.broadcast %cst_31 : f32 to vector<16x1xf32>
    %52 = arith.subf %51, %47 : vector<16x1xf32>
    %53 = math.exp %52 : vector<16x1xf32>
    %cst_32 = arith.constant dense<0.000000e+00> : vector<16xf32>
    %54 = vector.multi_reduction <add>, %50, %cst_32 [1] : vector<16x4xf32> to vector<16xf32>
    %55 = vector.shape_cast %54 : vector<16xf32> to vector<16x1xf32>
    %56 = arith.addf %55, %53 : vector<16x1xf32>
    %57 = tpu.reciprocal %56 {approx = true} : vector<16x1xf32> -> vector<16x1xf32>
    %58 = vector.broadcast %57 : vector<16x1xf32> to vector<16x4xf32>
    %59 = arith.mulf %50, %58 : vector<16x4xf32>
    %c0_33 = arith.constant 0 : index
    %c0_34 = arith.constant 0 : index
    %60 = vector.load %arg13[%c0_33, %c0_34] : memref<16x5xf32, #tpu.memory_space<vmem>>, vector<16x4xf32>
    tpu.vector_store %arg13[%c0_33, %c0_34], %59 {strides = array<i32>} : memref<16x5xf32, #tpu.memory_space<vmem>>, vector<16x4xf32>,
    %61 = arith.mulf %53, %57 : vector<16x1xf32>
    %c0_35 = arith.constant 0 : index
    %c4 = arith.constant 4 : index
    %62 = vector.load %arg13[%c0_35, %c4] : memref<16x5xf32, #tpu.memory_space<vmem>>, vector<16x1xf32>
    tpu.vector_store %arg13[%c0_35, %c4], %61 {strides = array<i32>} : memref<16x5xf32, #tpu.memory_space<vmem>>, vector<16x1xf32>,
    return
  }
  func.func @transform_0(%arg0: i32) -> (i32, i32) {
    %c0_i32 = arith.constant 0 : i32
    %c0_i32_0 = arith.constant 0 : i32
    return %arg0, %c0_i32 : i32, i32
  }
  func.func @transform_1(%arg0: i32) -> (i32, i32) {
    %c0_i32 = arith.constant 0 : i32
    %c0_i32_0 = arith.constant 0 : i32
    return %arg0, %c0_i32 : i32, i32
  }
  func.func @transform_2(%arg0: i32) -> (i32, i32) {
    %c0_i32 = arith.constant 0 : i32
    %c0_i32_0 = arith.constant 0 : i32
    return %arg0, %c0_i32 : i32, i32
  }
  func.func @transform_3(%arg0: i32) -> (i32, i32) {
    %c0_i32 = arith.constant 0 : i32
    %c0_i32_0 = arith.constant 0 : i32
    return %arg0, %c0_i32 : i32, i32
  }
  func.func @transform_4(%arg0: i32) -> (i32, i32) {
    %c0_i32 = arith.constant 0 : i32
    %c0_i32_0 = arith.constant 0 : i32
    %c0_i32_1 = arith.constant 0 : i32
    return %c0_i32, %c0_i32_0 : i32, i32
  }
  func.func @transform_5(%arg0: i32) -> (i32, i32) {
    %c0_i32 = arith.constant 0 : i32
    %c0_i32_0 = arith.constant 0 : i32
    %c0_i32_1 = arith.constant 0 : i32
    return %c0_i32, %c0_i32_0 : i32, i32
  }
  func.func @transform_6(%arg0: i32) -> (i32, i32) {
    %c0_i32 = arith.constant 0 : i32
    %c0_i32_0 = arith.constant 0 : i32
    %c0_i32_1 = arith.constant 0 : i32
    return %c0_i32, %c0_i32_0 : i32, i32
  }
  func.func @transform_7(%arg0: i32) -> (i32, i32) {
    %c0_i32 = arith.constant 0 : i32
    %c0_i32_0 = arith.constant 0 : i32
    %c0_i32_1 = arith.constant 0 : i32
    return %c0_i32, %c0_i32_0 : i32, i32
  }
  func.func @transform_8(%arg0: i32) -> (i32, i32) {
    %c0_i32 = arith.constant 0 : i32
    %c0_i32_0 = arith.constant 0 : i32
    %c0_i32_1 = arith.constant 0 : i32
    return %c0_i32, %c0_i32_0 : i32, i32
  }
  func.func @transform_9(%arg0: i32) -> (i32, i32) {
    %c0_i32 = arith.constant 0 : i32
    %c0_i32_0 = arith.constant 0 : i32
    %c0_i32_1 = arith.constant 0 : i32
    return %c0_i32, %c0_i32_0 : i32, i32
  }
  func.func @transform_10(%arg0: i32) -> (i32, i32) {
    %c0_i32 = arith.constant 0 : i32
    %c0_i32_0 = arith.constant 0 : i32
    %c0_i32_1 = arith.constant 0 : i32
    return %c0_i32, %c0_i32_0 : i32, i32
  }
  func.func @transform_11(%arg0: i32) -> (i32, i32) {
    %c0_i32 = arith.constant 0 : i32
    %c0_i32_0 = arith.constant 0 : i32
    return %arg0, %c0_i32 : i32, i32
  }
  func.func @transform_12(%arg0: i32) -> (i32, i32) {
    %c0_i32 = arith.constant 0 : i32
    %c0_i32_0 = arith.constant 0 : i32
    return %arg0, %c0_i32 : i32, i32
  }
}

</mosaic_0001>

<bundles_post_ra>
// kernel: pairwise_scorer_forward.1
= control target key start
LH: loop header
LB: loop body
LE: loop exit
PB: predicated region body
PF: predicated region fallthrough
CT: control target
= control target key end

     0   :  { %s1968_s21 = smov 0   ;;  %s2213_s0 = inlined_call_operand.vmem [shape: bf16[64,32], index: 0, kind: input, shape index: {}]   ;;  %s2214_s1 = inlined_call_operand.vmem [shape: bf16[256,32], index: 1, kind: input, shape index: {}]   ;;  %s2215_s2 = inlined_call_operand.vmem [shape: bf16[256,128], index: 2, kind: input, shape index: {}]   ;;  %s2216_s3 = inlined_call_operand.vmem [shape: f32[64,4], index: 3, kind: input, shape index: {}]   ;;  %s2217_s4 = inlined_call_operand.vmem [shape: bf16[32,128], index: 4, kind: input, shape index: {}]   ;;  %s2218_s5 = inlined_call_operand.vmem [shape: bf16[32,128], index: 5, kind: input, shape index: {}]   ;;  %s2219_s6 = inlined_call_operand.vmem [shape: bf16[32,128], index: 6, kind: input, shape index: {}]   ;;  %s2220_s7 = inlined_call_operand.vmem [shape: f32[1,128], index: 7, kind: input, shape index: {}]   ;;  %s2221_s8 = inlined_call_operand.vmem [shape: bf16[128,128], index: 8, kind: input, shape index: {}]   ;;  %s2222_s9 = inlined_call_operand.vmem [shape: f32[1,128], index: 9, kind: input, shape index: {}]   ;;  %s2223_s10 = inlined_call_operand.vmem [shape: f32[1,128], index: 10, kind: input, shape index: {}]   ;;  %s2224_s11 = inlined_call_operand.vmem [shape: f32[64,4], index: 11, kind: output, shape index: {0}]   ;;  %s2225_s12 = inlined_call_operand.vmem [shape: f32[64,5], index: 12, kind: output, shape index: {1}]  }
   0x1 LB: > { %s1670_s22 = sadd.s32 4294967295, %s1900_s21   ;;  %p1674_p0 = scmp.ge.s32.totalorder %s1900_s21, 1  ;;  %s1900_s21 = sphi %s1968_s21, %s23_s21  }
   0x2   : > { %p399_p1 = scmp.lt.s32.totalorder %s1900_s21, 5 }
   0x4   : > { %p400_p2 = pnand %p1674_p0, %p399_p1 }
   0x5   : > { %v1860_v0 = vld [vmem:[%s2218_s5] sm:$0xff] (!%p400_p2)   ;;  %s1675_s25 = sshll.u32 (!%p400_p2), %s1670_s22, 1  ;;  %v524_v1 = vlaneseq (!%p400_p2)  ;;  %v1861_v2 = vld [vmem:[%s2218_s5 + $0x8] sm:$0xff] (!%p400_p2)   ;;  %s1677_s28 = sshll.u32 (!%p400_p2), %s1670_s22, 3  ;;  %v1902_v5 = vmov (!%p400_p2), 1966171168  }
   0x6   : > { %403 = sbr.rel (%p400_p2) target bundleno = 991 (0x3df), region = 64  ;;  %p462_p3 = scmp.lt.s32.totalorder (!%p400_p2), %s1675_s25, 7  ;;  %1775 = vmatprep.subr.bf16.mxu0 (!%p400_p2), %v1860_v0  ;;  %v522_v6 = vunpack.c.l.s4 (!%p400_p2), %v1902_v5  ;;  %v1864_v8 = vld [vmem:[%s2217_s4] sm:$0xff] (!%p400_p2)   ;;  %v1871_v14 = vld [vmem:[%s2221_s8 + $0x8] sm:$0xff] (!%p400_p2)   ;;  %vm798_vm0 = vcmask (!%p400_p2), 261120   ;;  %v1872_v20 = vld [vmem:[%s2221_s8 + $0x10] sm:$0xff] (!%p400_p2)  }
   0x7   : > { %v525_v3 = vshrl.u32 (!%p400_p2), %v524_v1, 7  ;;  %v1412_v4 = vand.u32 (!%p400_p2), 127, %v524_v1  ;;  %1776 = vmatpush3.bf16.msra.mxu0 (!%p400_p2), %v1860_v0  ;;  %p468_p4 = scmp.lt.s32.totalorder (!%p400_p2), %s1677_s28, 31  ;;  %v1870_v13 = vld [vmem:[%s2221_s8] sm:$0xff] (!%p400_p2)   ;;  %v1867_v31 = vld [vmem:[%s2217_s4 + $0x8] sm:$0xff] (!%p400_p2)   ;;  %v1873_v32 = vld [vmem:[%s2221_s8 + $0x18] sm:$0xff] (!%p400_p2)  }
   0x8   : > { %1777 = vmatprep.subr.bf16.mxu0 (!%p400_p2), %v1861_v2  ;;  %v523_v9 = vunpack.c.0.s8 (!%p400_p2), %v522_v6  ;;  %1811 = vmatprep.subr.bf16.mxu1 (!%p400_p2), %v1870_v13  ;;  %v2044_v44 = vld [vmem:[%s2219_s6] sm:$0xff] (!%p400_p2)   ;;  %vm1344_vm1 = vcmask (!%p400_p2), 1043456   ;;  %vm1477_vm2 = vcmask (!%p400_p2), 1041409   ;;  %vm1479_vm3 = vcmask (!%p400_p2), 1042434  }
   0x9   : > { %v1984_v7 = vsub.s32 (!%p400_p2), %v1412_v4, %v525_v3  ;;  %1812 = vmatpush3.bf16.msra.mxu1 (!%p400_p2), %v1870_v13  ;;  %v2017_v21 = vsub.s32 (!%p400_p2), 0, %v525_v3  ;;  %v1874_v50 = vld [vmem:[%s2221_s8 + $0x20] sm:$0xff] (!%p400_p2)   ;;  %vm1481_vm4 = vcmask (!%p400_p2), 1043459   ;;  %vm1483_vm5 = vcmask (!%p400_p2), 1044484  }
   0xa   : > { %v1995_v11 = vsub.s32 (!%p400_p2), %v523_v9, %v525_v3  ;;  %1813 = vmatprep.subr.bf16.mxu1 (!%p400_p2), %v1871_v14  ;;  %vm1485_vm6 = vcmask (!%p400_p2), 1045509   ;;  %vm1487_vm7 = vcmask (!%p400_p2), 1046534   ;;  %vm1489_vm8 = vcmask (!%p400_p2), 1047559  }
   0xb   : > { %1778 = vmatpush3.bf16.msra.mxu0 (!%p400_p2), %v1861_v2  ;;  %vm1502_vm9 = vcmask (!%p400_p2), 31744   ;;  %vm1541_vm10 = vcmask (!%p400_p2), 39968  }
   0xc   : > { %1787 = vmatprep.subr.bf16.mxu0 (!%p400_p2), %v1864_v8 }
   0xd   : > { %s2227_s25 = smov (!%p462_p3, %s1675_s25), 7  ;;  %s2229_s28 = smov (!%p468_p4, %s1677_s28), 31  ;;  %1814 = vmatpush3.bf16.msra.mxu1 %v1871_v14 }
   0xe   : > { %s1676_s13 = sshll.u32 %s2227_s25, 2  ;;  %s1678_s19 = sshll.u32 %s2229_s28, 2  ;;  %1815 = vmatprep.subr.bf16.mxu1 %v1872_v20 }
   0xf   : > { %s465_s16 = scalar_lea.vmem %s2213_s0, %s1676_s13  ;;  %s2009_s26 = scalar_lea.vmem %s2214_s1, %s1678_s19 }
  0x10   : > { %v1723_v10 = vld [vmem:[%s465_s16] sm:$0xff]   ;;  %v504_v22 = vld [vmem:[%s2009_s26 + $0x8] sm:$0xff]   ;;  %v506_v36 = vld [vmem:[%s2009_s26 + $0x10] sm:$0xff]   ;;  %s477_s16 = scalar_lea.vmem %s2215_s2, %s1678_s19  ;;  %s2166_s23 = sshll.u32 %s2227_s25, 3 }
  0x11   : > { %v1724_v12 = vunpack.c.l.bf16 %v1723_v10  ;;  %v502_v17 = vld [vmem:[%s2009_s26] sm:$0xff]   ;;  %v1725_v29 = vunpack.c.h.bf16 %v1723_v10  ;;  %1816 = vmatpush3.bf16.msra.mxu1 %v1872_v20  ;;  %v2038_v41 = vld [vmem:[%s2009_s26 + $0x18] sm:$0xff]   ;;  %v512_v54 = vunpack.c.l.bf16 %v504_v22  ;;  %v513_v5 = vunpack.c.h.bf16 %v504_v22  ;;  %s483_s27 = scalar_lea.vmem %s2216_s3, %s2166_s23  ;;  %s489_s30 = scalar_lea.vmem %s2224_s11, %s2166_s23 }
  0x12   : > { %1779 = vmatprep.mubr.msk.bf16.mxu0 %vm798_vm0, %v502_v17  ;;  %v510_v40 = vunpack.c.l.bf16 %v502_v17  ;;  %v511_v43 = vunpack.c.h.bf16 %v502_v17  ;;  %1817 = vmatprep.subr.bf16.mxu1 %v1873_v32  ;;  %s495_s15 = scalar_lea.vmem %s2225_s12, %s2166_s23 }
  0x13   : > { %v520_v15 = vcombine.high %v1724_v12, %v1724_v12  ;;  %v527_v16 = vrot.slane %v1724_v12, %v1995_v11  ;;  %1780 = vmatmul.mubr.msk.bf16.vlgmr.msra.gmra.mrb[0].mxu0 %vm798_vm0, %v504_v22  ;;  %v576_v42 = vrot.slane %v1725_v29, %v1995_v11  ;;  %v569_v45 = vcombine.high %v1725_v29, %v1725_v29 }
  0x14   : > { %1788 = vmatpush3.bf16.msra.mxu0 %v1864_v8  ;;  %1783 = vmatprep.mubr.msk.bf16.mxu0 %vm798_vm0, %v506_v36  ;;  %v706_v53 = vcombine.high %v510_v40, %v510_v40  ;;  %v707_v56 = vcombine.high %v511_v43, %v511_v43 }
  0x15   : > { %v535_v18 = vcombine.high %v527_v16, %v527_v16  ;;  %v543_v19 = vrot.slane %v527_v16, %v1995_v11  ;;  %v534_v23 = vrot.slane %v520_v15, %v1995_v11  ;;  %1789 = vmatprep.subr.bf16.mxu0 %v1867_v31  ;;  %1818 = vmatpush3.bf16.msra.mxu1 %v1873_v32 }
  0x16   : > { %v584_v55 = vcombine.high %v576_v42, %v576_v42  ;;  %v592_v58 = vrot.slane %v576_v42, %v1995_v11  ;;  %v583_v59 = vrot.slane %v569_v45, %v1995_v11  ;;  %1819 = vmatprep.subr.bf16.mxu1 %v1874_v50 }
  0x17   : > { %v557_v24 = vrot.slane %v535_v18, %v1995_v11  ;;  %v536_v25 = vcombine.high %v534_v23, %v534_v23  ;;  %v550_v26 = vrot.slane %v534_v23, %v1995_v11  ;;  %v565_v27 = vcombine.high %v543_v19, %v543_v19 }
  0x18   : > { %v621_v33 = vrot.slane %v543_v19, %v2017_v21  ;;  %1790 = vmatpush3.bf16.msra.mxu0 %v1867_v31  ;;  %v606_v63 = vrot.slane %v584_v55, %v1995_v11  ;;  %v614_v0 = vcombine.high %v592_v58, %v592_v58  ;;  %v653_v1 = vrot.slane %v592_v58, %v2017_v21 }
  0x19   : > { %v567_v28 = vcombine.high %v557_v24, %v557_v24  ;;  %v564_v30 = vrot.slane %v536_v25, %v1995_v11  ;;  %v566_v34 = vcombine.high %v550_v26, %v550_v26  ;;  %v625_v37 = vrot.slane %v557_v24, %v2017_v21  ;;  %1799 = vmatprep.subr.bf16.mxu0 %v2044_v44 }
  0x1a   : > { %v629_v38 = vrot.slane %v565_v27, %v2017_v21  ;;  %v2047_v46 = vrot.slane %v550_v26, %v2017_v21  ;;  %v722_v60 = vmul.f32 %v621_v33, %v510_v40  ;;  %v585_v2 = vcombine.high %v583_v59, %v583_v59  ;;  %1820 = vmatpush3.bf16.msra.mxu1 %v1874_v50 }
  0x1b   : > { %v568_v35 = vcombine.high %v564_v30, %v564_v30  ;;  %v633_v39 = vrot.slane %v567_v28, %v2017_v21  ;;  %v2050_v47 = vrot.slane %v564_v30, %v2017_v21  ;;  %v2053_v48 = vrot.slane %v566_v34, %v2017_v21  ;;  %1784 = vmatmul.mubr.msk.bf16.gmra.mrb[4].mxu0 %vm798_vm0, %v2038_v41 }
  0x1c   : > { %v738_v51 = vcombine.low %v621_v33, %v625_v37  ;;  %v599_v3 = vrot.slane %v583_v59, %v1995_v11  ;;  %v723_v4 = vmul.f32 %v706_v53, %v625_v37  ;;  %v616_v6 = vcombine.high %v606_v63, %v606_v63 }
  0x1d   : > { %v2056_v49 = vrot.slane %v568_v35, %v2017_v21  ;;  %v739_v52 = vcombine.low %v629_v38, %v633_v39  ;;  %v740_v61 = vcombine.low %v2047_v46, %v2050_v47  ;;  %v657_v8 = vrot.slane %v606_v63, %v2017_v21  ;;  %v1876_v63 = vld [vmem:[%s2221_s8 + $0x30] sm:$0xff]  }
  0x1e   : > { %v724_v9 = vmul.f32 %v629_v38, %v511_v43  ;;  %v661_v10 = vrot.slane %v614_v0, %v2017_v21  ;;  %v613_v12 = vrot.slane %v585_v2, %v1995_v11  ;;  %v615_v13 = vcombine.high %v599_v3, %v599_v3  ;;  %v1869_v11 = vld [vmem:[%s2219_s6 + $0x8] sm:$0xff]   ;;  %v1877_v0 = vld [vmem:[%s2221_s8 + $0x38] sm:$0xff]   ;;  %v1727_v2 = vld [vmem:[%s477_s16] sm:$0xff]  }
  0x1f   : > { %v754_v57 = vpack.c.bf16 %v739_v52, %v738_v51  ;;  %v741_v62 = vcombine.low %v2053_v48, %v2056_v49  ;;  %v725_v14 = vmul.f32 %v707_v56, %v633_v39  ;;  %v665_v16 = vrot.slane %v616_v6, %v2017_v21 }
  0x20   : > { %v742_v17 = vcombine.low %v653_v1, %v657_v8  ;;  %v617_v18 = vcombine.high %v613_v12, %v613_v12  ;;  %v669_v19 = vrot.slane %v599_v3, %v2017_v21  ;;  %v673_v20 = vrot.slane %v613_v12, %v2017_v21 }
  0x21   : > { %1791 = vmatprep.mubr.msk.bf16.mxu0 %vm798_vm0, %v754_v57  ;;  %v755_v15 = vpack.c.bf16 %v741_v62, %v740_v61  ;;  %v677_v22 = vrot.slane %v615_v13, %v2017_v21  ;;  %v514_v23 = vunpack.c.l.bf16 %v506_v36  ;;  %v515_v24 = vunpack.c.h.bf16 %v506_v36  ;;  %v1875_v62 = vld [vmem:[%s2221_s8 + $0x28] sm:$0xff]  }
  0x22   : > { %v743_v25 = vcombine.low %v661_v10, %v665_v16  ;;  %v681_v26 = vrot.slane %v617_v18, %v2017_v21  ;;  %v708_v27 = vcombine.high %v512_v54, %v512_v54  ;;  %v709_v28 = vcombine.high %v513_v5, %v513_v5  ;;  %1821 = vmatprep.subr.bf16.mxu1 %v1875_v62 }
  0x23   : > { %v981_v30 = vcombine.low %v722_v60, %v723_v4  ;;  %v982_v31 = vcombine.low %v724_v9, %v725_v14  ;;  %1792 = vmatmul.mubr.msk.bf16.vlgmr.msra.gmra.mrb[0].mxu0 %vm798_vm0, %v755_v15  ;;  %v744_v32 = vcombine.low %v669_v19, %v673_v20  ;;  %v710_v34 = vcombine.high %v514_v23, %v514_v23  ;;  %v1744_v15 = vld [vmem:[%s477_s16 + $0x18] sm:$0xff]  }
  0x24   : > { %v756_v29 = vpack.c.bf16 %v743_v25, %v742_v17  ;;  %v745_v33 = vcombine.low %v677_v22, %v681_v26  ;;  %v711_v35 = vcombine.high %v515_v24, %v515_v24  ;;  %1800 = vmatpush3.bf16.msra.mxu0 %v2044_v44  ;;  %v726_v21 = vmul.f32 %v2047_v46, %v512_v54 }
  0x25   : > { %1801 = vmatprep.subr.bf16.mxu0 %v1869_v11  ;;  %v727_v36 = vmul.f32 %v708_v27, %v2050_v47  ;;  %v728_v37 = vmul.f32 %v2053_v48, %v513_v5  ;;  %v729_v38 = vmul.f32 %v709_v28, %v2056_v49  ;;  %v516_v39 = vunpack.c.l.bf16 %v2038_v41  ;;  %1822 = vmatpush3.bf16.msra.mxu1 %v1875_v62 }
  0x26   : > { %1795 = vmatprep.mubr.msk.bf16.mxu0 %vm798_vm0, %v756_v29  ;;  %v517_v40 = vunpack.c.h.bf16 %v2038_v41  ;;  %v757_v42 = vpack.c.bf16 %v745_v33, %v744_v32  ;;  %v997_v43 = vpack.c.bf16 %v982_v31, %v981_v30  ;;  %v730_v45 = vmul.f32 %v653_v1, %v514_v23  ;;  %1823 = vmatprep.subr.bf16.mxu1 %v1876_v63  ;;  %v1742_v1 = vld [vmem:[%s477_s16 + $0x8] sm:$0xff]  }
  0x27   : > { %v731_v44 = vmul.f32 %v710_v34, %v657_v8  ;;  %v732_v50 = vmul.f32 %v661_v10, %v515_v24  ;;  %v733_v51 = vmul.f32 %v711_v35, %v665_v16  ;;  %v983_v52 = vcombine.low %v726_v21, %v727_v36  ;;  %v1709_v8 = vld [vmem:[%s2220_s7] ss:$0 sm:$0xff] }
  0x28   : > { %1802 = vmatpush3.bf16.msra.mxu0 %v1869_v11  ;;  %v984_v53 = vcombine.low %v728_v37, %v729_v38  ;;  %v712_v46 = vcombine.high %v516_v39, %v516_v39  ;;  %v713_v54 = vcombine.high %v517_v40, %v517_v40  ;;  %v734_v55 = vmul.f32 %v669_v19, %v516_v39  ;;  %v1743_v19 = vld [vmem:[%s477_s16 + $0x10] sm:$0xff]  }
  0x29   : > { %v985_v47 = vcombine.low %v730_v45, %v731_v44  ;;  %v986_v48 = vcombine.low %v732_v50, %v733_v51  ;;  %v736_v56 = vmul.f32 %v677_v22, %v517_v40  ;;  %1824 = vmatpush3.bf16.msra.mxu1 %v1876_v63  ;;  %v1732_v3 = vunpack.c.l.bf16 %v1742_v1 }
  0x2a   : > { %v998_v49 = vpack.c.bf16 %v984_v53, %v983_v52  ;;  %v735_v41 = vmul.f32 %v712_v46, %v673_v20  ;;  %v737_v57 = vmul.f32 %v713_v54, %v681_v26  ;;  %1825 = vmatprep.subr.bf16.mxu1 %v1877_v0  ;;  %v1728_v4 = vunpack.c.l.bf16 %v1727_v2 }
  0x2b   : > { %1796 = vmatmul.mubr.msk.bf16.gmra.mrb[4].mxu0 %vm798_vm0, %v757_v42  ;;  %v999_v58 = vpack.c.bf16 %v986_v48, %v985_v47  ;;  %v1733_v5 = vunpack.c.h.bf16 %v1742_v1  ;;  %v1729_v9 = vunpack.c.h.bf16 %v1727_v2  ;;  %v1740_v24 = vunpack.c.l.bf16 %v1744_v15  ;;  %v1710_v47 = vld [vmem:[%s2222_s9] ss:$0 sm:$0xff] }
  0x2c   : > { %1803 = vmatprep.mubr.msk.bf16.mxu0 %vm798_vm0, %v997_v43  ;;  %v987_v59 = vcombine.low %v734_v55, %v735_v41  ;;  %v988_v60 = vcombine.low %v736_v56, %v737_v57  ;;  %v1736_v25 = vunpack.c.l.bf16 %v1743_v19  ;;  %v1741_v28 = vunpack.c.h.bf16 %v1744_v15  ;;  %v2123_v57 = vld [vmem:[%s2223_s10] ss:$0 sm:$0xff] }
  0x2d   : > { %1826 = vmatpush3.bf16.msra.mxu1 %v1877_v0  ;;  %v1737_v30 = vunpack.c.h.bf16 %v1743_v19 }
  0x2e   : > { %v1000_v61 = vpack.c.bf16 %v988_v60, %v987_v59 }
  0x33   : > { %1804 = vmatmul.mubr.msk.bf16.vlgmr.msra.gmra.mrb[0].mxu0 %vm798_vm0, %v998_v49 }
  0x34   : > { %1807 = vmatprep.mubr.msk.bf16.mxu0 %vm798_vm0, %v999_v58 }
  0x3b   : > { %1808 = vmatmul.mubr.msk.bf16.gmra.mrb[4].mxu0 %vm798_vm0, %v1000_v61 }
 0x106   : > { %v1805_v6 = vpop.f32.mrb[0].mxu0 }
 0x107   : > { %v1120_v10 = vadd.f32 %v1805_v6, %v1732_v3  ;;  %v1063_v12 = vpop.f32.mrb[1].mxu0 }
 0x108   : > { %v1118_v13 = vadd.f32 %v1728_v4, %v1063_v12  ;;  %v1806_v14 = vpop.f32.mrb[2].mxu0 }
 0x109   : > { %v1135_v16 = vadd.f32 %v1709_v8, %v1120_v10  ;;  %v1121_v17 = vadd.f32 %v1806_v14, %v1733_v5  ;;  %v1066_v18 = vpop.f32.mrb[3].mxu0 }
 0x10a   : > { %v1119_v20 = vadd.f32 %v1729_v9, %v1066_v18  ;;  %v1133_v22 = vadd.f32 %v1709_v8, %v1118_v13 }
 0x10b   : > { %v1136_v23 = vadd.f32 %v1709_v8, %v1121_v17  ;;  %v1143_v11 = vmax.f32 %v1135_v16, 0.0 }
 0x10c   : > { %v1134_v26 = vadd.f32 %v1709_v8, %v1119_v20  ;;  %v1141_v31 = vmax.f32 %v1133_v22, 0.0 }
 0x10d   : > { %v1144_v27 = vmax.f32 %v1136_v23, 0.0 }
 0x10e   : > { %v1809_v29 = vpop.f32.mrb[4].mxu0  ;;  %v1142_v32 = vmax.f32 %v1134_v26, 0.0 }
 0x10f   : > { %v1124_v33 = vadd.f32 %v1809_v29, %v1740_v24  ;;  %v1079_v34 = vpop.f32.mrb[5].mxu0  ;;  %v1150_v35 = vpack.c.bf16 %v1144_v27, %v1143_v11 }
 0x110   : > { %v1122_v21 = vadd.f32 %v1736_v25, %v1079_v34  ;;  %v1810_v36 = vpop.f32.mrb[6].mxu0  ;;  %v1149_v37 = vpack.c.bf16 %v1142_v32, %v1141_v31 }
 0x111   : > { %v1139_v38 = vadd.f32 %v1709_v8, %v1124_v33  ;;  %v1125_v39 = vadd.f32 %v1810_v36, %v1741_v28  ;;  %v1082_v40 = vpop.f32.mrb[7].mxu0 }
 0x112   : > { %v1137_v42 = vadd.f32 %v1709_v8, %v1122_v21  ;;  %v1123_v43 = vadd.f32 %v1737_v30, %v1082_v40  ;;  %1827 = vmatprep.mubr.bf16.mxu1 %v1149_v37 }
 0x113   : > { %v1140_v45 = vadd.f32 %v1709_v8, %v1125_v39  ;;  %1828 = vmatmul.mubr.bf16.vlgmr.msra.gmra.mrb[0].mxu1 %v1150_v35  ;;  %v1147_v50 = vmax.f32 %v1139_v38, 0.0 }
 0x114   : > { %v1138_v44 = vadd.f32 %v1709_v8, %v1123_v43  ;;  %v1145_v52 = vmax.f32 %v1137_v42, 0.0 }
 0x115   : > { %v1148_v51 = vmax.f32 %v1140_v45, 0.0 }
 0x116   : > { %v1146_v53 = vmax.f32 %v1138_v44, 0.0 }
 0x117   : > { %v1152_v46 = vpack.c.bf16 %v1148_v51, %v1147_v50 }
 0x118   : > { %v1151_v54 = vpack.c.bf16 %v1146_v53, %v1145_v52 }
 0x11a   : > { %1831 = vmatprep.mubr.bf16.mxu1 %v1151_v54 }
 0x11b   : > { %1832 = vmatmul.mubr.bf16.gmra.mrb[4].mxu1 %v1152_v46 }
 0x1e6   : > { %v1829_v48 = vpop.f32.mrb[0].mxu1 }
 0x1e7   : > { %v1267_v49 = vadd.f32 %v1829_v48, %v1710_v47  ;;  %v1258_v55 = vpop.f32.mrb[1].mxu1 }
 0x1e8   : > { %v1259_v41 = vadd.f32 %v1710_v47, %v1258_v55  ;;  %v1830_v56 = vpop.f32.mrb[2].mxu1 }
 0x1e9   : > { %v1291_v58 = vmax.f32 %v1267_v49, 0.0  ;;  %v1270_v59 = vadd.f32 %v1830_v56, %v1710_v47  ;;  %v1261_v60 = vpop.f32.mrb[3].mxu1 }
 0x1ea   : > { %v1289_v61 = vmax.f32 %v1259_v41, 0.0  ;;  %v1262_v3 = vadd.f32 %v1710_v47, %v1261_v60 }
 0x1eb   : > { %v1307_v62 = vcombine.high %v1291_v58, %v1291_v58  ;;  %v1332_v63 = vmul.f32 %v2123_v57, %v1291_v58  ;;  %v1292_v2 = vmax.f32 %v1270_v59, 0.0 }
 0x1ec   : > { %v1305_v0 = vcombine.high %v1289_v61, %v1289_v61  ;;  %v1328_v1 = vmul.f32 %v2123_v57, %v1289_v61  ;;  %v1290_v15 = vmax.f32 %v1262_v3, 0.0 }
 0x1ed   : > { %v1357_v4 = vsel %vm1344_vm1, %v1332_v63, 0.0  ;;  %v1333_v5 = vmul.f32 %v2123_v57, %v1307_v62  ;;  %v1334_v19 = vmul.f32 %v2123_v57, %v1292_v2  ;;  %v1308_v36 = vcombine.high %v1292_v2, %v1292_v2 }
 0x1ee   : > { %1358 = vadd.xlane.f32.xlu1 %v1357_v4  ;;  %v1833_v6 = vpop.f32.mrb[4].mxu1  ;;  %v1345_v8 = vsel %vm1344_vm1, %v1328_v1, 0.0  ;;  %v1329_v9 = vmul.f32 %v2123_v57, %v1305_v0  ;;  %v1306_v25 = vcombine.high %v1290_v15, %v1290_v15  ;;  %v1330_v27 = vmul.f32 %v2123_v57, %v1290_v15 }
 0x1ef   : > { %v1283_v10 = vadd.f32 %v1833_v6, %v1710_v47  ;;  %1346 = vadd.xlane.f32.xlu0 %v1345_v8  ;;  %v1274_v12 = vpop.f32.mrb[5].mxu1  ;;  %v1360_v18 = vsel %vm1344_vm1, %v1333_v5, 0.0  ;;  %v1363_v26 = vsel %vm1344_vm1, %v1334_v19, 0.0  ;;  %v1335_v50 = vmul.f32 %v2123_v57, %v1308_v36 }
 0x1f0   : > { %v1275_v13 = vadd.f32 %v1710_v47, %v1274_v12  ;;  %v1834_v14 = vpop.f32.mrb[6].mxu1  ;;  %v1348_v22 = vsel %vm1344_vm1, %v1329_v9, 0.0  ;;  %v1351_v32 = vsel %vm1344_vm1, %v1330_v27, 0.0  ;;  %v1331_v33 = vmul.f32 %v2123_v57, %v1306_v25 }
 0x1f1   : > { %v1295_v16 = vmax.f32 %v1283_v10, 0.0  ;;  %v1277_v17 = vpop.f32.mrb[7].mxu1  ;;  %v1286_v31 = vadd.f32 %v1834_v14, %v1710_v47  ;;  %v1366_v53 = vsel %vm1344_vm1, %v1335_v50, 0.0 }
 0x1f2   : > { %v1293_v20 = vmax.f32 %v1275_v13, 0.0  ;;  %1361 = vadd.xlane.f32.xlu1 %v1360_v18  ;;  %v1278_v29 = vadd.f32 %v1710_v47, %v1277_v17  ;;  %v1354_v38 = vsel %vm1344_vm1, %v1331_v33, 0.0 }
 0x1f3   : > { %v1311_v23 = vcombine.high %v1295_v16, %v1295_v16  ;;  %1349 = vadd.xlane.f32.xlu0 %v1348_v22  ;;  %v1340_v24 = vmul.f32 %v2123_v57, %v1295_v16  ;;  %v1296_v37 = vmax.f32 %v1286_v31, 0.0 }
 0x1f4   : > { %v1309_v28 = vcombine.high %v1293_v20, %v1293_v20  ;;  %v1294_v34 = vmax.f32 %v1278_v29, 0.0  ;;  %v1336_v39 = vmul.f32 %v2123_v57, %v1293_v20 }
 0x1f5   : > { %v1381_v11 = vsel %vm1344_vm1, %v1340_v24, 0.0  ;;  %v1341_v30 = vmul.f32 %v2123_v57, %v1311_v23  ;;  %v1312_v45 = vcombine.high %v1296_v37, %v1296_v37  ;;  %v1342_v47 = vmul.f32 %v2123_v57, %v1296_v37  ;;  %v1393_v24 = vld [vmem:[%s483_s27] sm:$0xff] }
 0x1f6   : > { %1364 = vadd.xlane.f32.xlu1 %v1363_v26  ;;  %v1337_v21 = vmul.f32 %v2123_v57, %v1309_v28  ;;  %v1310_v40 = vcombine.high %v1294_v34, %v1294_v34  ;;  %v1338_v43 = vmul.f32 %v2123_v57, %v1294_v34  ;;  %v1369_v44 = vsel %vm1344_vm1, %v1336_v39, 0.0 }
 0x1f7   : > { %1382 = vadd.xlane.f32.xlu0 %v1381_v11  ;;  %v1384_v35 = vsel %vm1344_vm1, %v1341_v30, 0.0  ;;  %v1343_v46 = vmul.f32 %v2123_v57, %v1312_v45  ;;  %v1387_v49 = vsel %vm1344_vm1, %v1342_v47, 0.0 }
 0x1f8   : > { %v1372_v42 = vsel %vm1344_vm1, %v1337_v21, 0.0  ;;  %v1375_v51 = vsel %vm1344_vm1, %v1338_v43, 0.0  ;;  %v1339_v52 = vmul.f32 %v2123_v57, %v1310_v40 }
 0x1f9   : > { %v1390_v48 = vsel %vm1344_vm1, %v1343_v46, 0.0 }
 0x1fa   : > { %1352 = vadd.xlane.f32.xlu1 %v1351_v32  ;;  %v1378_v54 = vsel %vm1344_vm1, %v1339_v52, 0.0 }
 0x1fb   : > { %1385 = vadd.xlane.f32.xlu0 %v1384_v35 }
 0x1fe   : > { %1355 = vadd.xlane.f32.xlu1 %v1354_v38  ;;  %v1394_v38 = vld [vmem:[%s483_s27 + $0x8] sm:$0xff] }
 0x1ff   : > { %1373 = vadd.xlane.f32.xlu0 %v1372_v42 }
 0x202   : > { %1370 = vadd.xlane.f32.xlu1 %v1369_v44 }
 0x203   : > { %1376 = vadd.xlane.f32.xlu0 %v1375_v51 }
 0x206   : > { %1367 = vadd.xlane.f32.xlu1 %v1366_v53 }
 0x207   : > { %1379 = vadd.xlane.f32.xlu0 %v1378_v54 }
 0x20a   : > { %1391 = vadd.xlane.f32.xlu1 %v1390_v48 }
 0x20b   : > { %1388 = vadd.xlane.f32.xlu0 %v1387_v49 }
 0x27b   : > { %v1359_v55 = vpop.xlane.xlu1 %1358 }
 0x27c   : > { %v1347_v41 = vpop.xlane.xlu0 %1346  ;;  %v1432_v5 = vrot.slane %v1359_v55, %v1984_v7 }
 0x27d   : > { %v1416_v0 = vrot.slane %v1347_v41, %v1984_v7 }
 0x27f   : > { %v1362_v56 = vpop.xlane.xlu1 %1361 }
 0x280   : > { %v1350_v58 = vpop.xlane.xlu0 %1349  ;;  %v1436_v12 = vrot.slane %v1362_v56, %v1984_v7 }
 0x281   : > { %v1420_v62 = vrot.slane %v1350_v58, %v1984_v7 }
 0x283   : > { %v1365_v59 = vpop.xlane.xlu1 %1364  ;;  %v1478_v2 = vsel %vm1477_vm2, %v1420_v62, %v1416_v0 }
 0x284   : > { %v1383_v60 = vpop.xlane.xlu0 %1382  ;;  %v1440_v18 = vrot.slane %v1365_v59, %v1984_v7 }
 0x285   : > { %v1464_v11 = vrot.slane %v1383_v60, %v1984_v7 }
 0x287   : > { %v1353_v61 = vpop.xlane.xlu1 %1352 }
 0x288   : > { %v1386_v63 = vpop.xlane.xlu0 %1385  ;;  %v1424_v57 = vrot.slane %v1353_v61, %v1984_v7 }
 0x289   : > { %v1468_v29 = vrot.slane %v1386_v63, %v1984_v7 }
 0x28a   : > { %v1480_v6 = vsel %vm1479_vm3, %v1424_v57, %v1478_v2 }
 0x28b   : > { %v1356_v1 = vpop.xlane.xlu1 %1355 }
 0x28c   : > { %v1428_v3 = vrot.slane %v1356_v1, %v1984_v7  ;;  %v1374_v4 = vpop.xlane.xlu0 %1373 }
 0x28d   : > { %v1452_v15 = vrot.slane %v1374_v4, %v1984_v7 }
 0x28e   : > { %v1482_v8 = vsel %vm1481_vm4, %v1428_v3, %v1480_v6 }
 0x28f   : > { %v1484_v9 = vsel %vm1483_vm5, %v1432_v5, %v1482_v8  ;;  %v1371_v10 = vpop.xlane.xlu1 %1370 }
 0x290   : > { %v1448_v13 = vrot.slane %v1371_v10, %v1984_v7  ;;  %v1377_v14 = vpop.xlane.xlu0 %1376  ;;  %v1486_v17 = vsel %vm1485_vm6, %v1436_v12, %v1484_v9 }
 0x291   : > { %v1456_v16 = vrot.slane %v1377_v14, %v1984_v7  ;;  %v1488_v25 = vsel %vm1487_vm7, %v1440_v18, %v1486_v17 }
 0x292   : > { %v1491_v19 = vsel %vm1477_vm2, %v1452_v15, %v1448_v13 }
 0x293   : > { %v1368_v20 = vpop.xlane.xlu1 %1367  ;;  %v1492_v27 = vsel %vm1479_vm3, %v1456_v16, %v1491_v19 }
 0x294   : > { %v1444_v22 = vrot.slane %v1368_v20, %v1984_v7  ;;  %v1380_v23 = vpop.xlane.xlu0 %1379 }
 0x295   : > { %v1460_v26 = vrot.slane %v1380_v23, %v1984_v7 }
 0x296   : > { %v1490_v28 = vsel %vm1489_vm8, %v1444_v22, %v1488_v25 }
 0x297   : > { %v1493_v30 = vsel %vm1481_vm4, %v1460_v26, %v1492_v27  ;;  %v1392_v31 = vpop.xlane.xlu1 %1391  ;;  %v1500_v32 = vadd.f32 %v1490_v28, %v1393_v24 }
 0x298   : > { %v1494_v33 = vsel %vm1483_vm5, %v1464_v11, %v1493_v30  ;;  %v1389_v34 = vpop.xlane.xlu0 %1388  ;;  %v1476_v37 = vrot.slane %v1392_v31, %v1984_v7 }
 0x299   : > { %v1495_v35 = vsel %vm1485_vm6, %v1468_v29, %v1494_v33  ;;  %v1472_v21 = vrot.slane %v1389_v34, %v1984_v7  ;;  %1503 = vst.msk [vmem:[%s489_s30] sm:$0xff] %vm1502_vm9, %v1500_v32  ;;  %v1505_v36 = vsel %vm1502_vm9, %v1500_v32, -inf }
 0x29a   : > { %1506 = vmax.xlane.f32.xlu0 %v1505_v36 }
 0x29b   : > { %v1496_v39 = vsel %vm1487_vm7, %v1472_v21, %v1495_v35 }
 0x29c   : > { %v1497_v40 = vsel %vm1489_vm8, %v1476_v37, %v1496_v39 }
 0x29d   : > { %v1501_v42 = vadd.f32 %v1497_v40, %v1394_v38 }
 0x29f   : > { %v1508_v43 = vsel %vm1502_vm9, %v1501_v42, -inf  ;;  %1504 = vst.msk [vmem:[%s489_s30 + $0x8] sm:$0xff] %vm1502_vm9, %v1501_v42 }
 0x2a0   : > { %1509 = vmax.xlane.f32.xlu1 %v1508_v43 }
 0x327   : > { %v1507_v45 = vpop.xlane.xlu0 %1506 }
 0x328   : > { %v1511_v44 = vmax.f32 %v1507_v45, 0.0 }
 0x32a   : > { %v1513_v50 = vsub.f32 %v1500_v32, %v1511_v44  ;;  %v1519_v55 = vsub.f32 0.0, %v1511_v44 }
 0x32c   : > { %v1515_v51 = vmul.f32 1.442695, %v1513_v50  ;;  %v1521_v41 = vmul.f32 1.442695, %v1519_v55 }
 0x32d   : > { %v1510_v52 = vpop.xlane.xlu1 %1509 }
 0x32e   : > { %1882 = vpow2.f32 %v1515_v51  ;;  %v1512_v53 = vmax.f32 %v1510_v52, 0.0 }
 0x330   : > { %v1514_v7 = vsub.f32 %v1501_v42, %v1512_v53  ;;  %v1520_v56 = vsub.f32 0.0, %v1512_v53 }
 0x332   : > { %v1517_v46 = vmul.f32 1.442695, %v1514_v7  ;;  %v1523_v58 = vmul.f32 1.442695, %v1520_v56 }
 0x334   : > { %1884 = vpow2.f32 %v1517_v46 }
 0x335   : > { %1886 = vpow2.f32 %v1521_v41 }
 0x336   : > { %1888 = vpow2.f32 %v1523_v58 }
 0x338   : > { %v1883_v54 = vpop.eup %1882 }
 0x339   : > { %v1525_v47 = vsel %vm1502_vm9, %v1883_v54, 0.0 }
 0x33a   : > { %1526 = vadd.xlane.f32.xlu0 %v1525_v47 }
 0x33e   : > { %v1885_v48 = vpop.eup %1884 }
 0x33f   : > { %v1528_v49 = vsel %vm1502_vm9, %v1885_v48, 0.0  ;;  %v1887_v59 = vpop.eup %1886 }
 0x340   : > { %1529 = vadd.xlane.f32.xlu1 %v1528_v49  ;;  %v1889_v62 = vpop.eup %1888 }
 0x3c7   : > { %v1527_v60 = vpop.xlane.xlu0 %1526 }
 0x3c8   : > { %v1531_v61 = vadd.f32 %v1887_v59, %v1527_v60 }
 0x3ca   : > { %1890 = vrcp.f32 %v1531_v61 }
 0x3cd   : > { %v1530_v63 = vpop.xlane.xlu1 %1529 }
 0x3ce   : > { %v1532_v57 = vadd.f32 %v1889_v62, %v1530_v63 }
 0x3d0   : > { %1892 = vrcp.f32 %v1532_v57 }
 0x3d4   : > { %v1891_v0 = vpop.eup %1890 }
 0x3d5   : > { %v1535_v1 = vmul.f32 %v1891_v0, %v1883_v54  ;;  %v1539_v4 = vmul.f32 %v1891_v0, %v1887_v59 }
 0x3d7   : > { %1537 = vst.msk [vmem:[%s495_s15] sm:$0xff] %vm1502_vm9, %v1535_v1 }
 0x3d8   : > { %1542 = vst.msk [vmem:[%s495_s15] sm:$0xff] %vm1541_vm10, %v1539_v4 }
 0x3da   : > { %v1893_v2 = vpop.eup %1892 }
 0x3db   : > { %v1536_v3 = vmul.f32 %v1893_v2, %v1885_v48  ;;  %v1540_v5 = vmul.f32 %v1893_v2, %v1889_v62 }
 0x3dd   : > { %1538 = vst.msk [vmem:[%s495_s15 + $0x8] sm:$0xff] %vm1502_vm9, %v1536_v3 }
 0x3de   : > { %1543 = vst.msk [vmem:[%s495_s15 + $0x8] sm:$0xff] %vm1541_vm10, %v1540_v5 }
 0x3df PF: > { %s23_s21 = sadd.s32 1, %s1900_s21  }
 0x3e0   : > { %p20_p5 = scmp.ge.s32.totalorder %s23_s21, 6  }
 0x3e2   :  { %22 = sbr.rel (!%p20_p5) target bundleno = 1 (0x1), region = 115 }

</bundles_post_ra>
